<compile_context>
chip_gen: v6e
topology: v6e:2x2x1
jax: 0.10.0
libtpu: 0.0.40
codegen_flags: <defaults>
</compile_context>

<pallas_src>
import functools

import jax
import jax.numpy as jnp
from jax import lax
from jax.experimental import pallas as pl
from jax.experimental.pallas import tpu as pltpu

HIDDEN = 32       # hidden_size (small synthetic size; real UNITER = 768)
LABEL_DIM = 64    # label_dim   (small synthetic size; real UNITER = 1601)
LN_EPS = 1e-12


def _round_up(x, m):
    return (x + m - 1) // m * m


def _vmem_capacity_bytes():
    try:
        cap = int(pltpu.get_tpu_info().vmem_capacity_bytes)
        return max(cap, 32 * 1024 * 1024)
    except Exception:
        return 64 * 1024 * 1024  # conservative (v7x per-TC VMEM)


def _choose_tile_n(n, h_pad, l_pad, itemsize, vmem_cap):
    """Largest row tile whose double-buffered streamed footprint (x + labels)
    stays inside a generation-appropriate VMEM budget, capped so the parallel
    grid gets at least 2 steps when N allows it. Always a multiple of 8."""
    if vmem_cap >= 128 * 1024 * 1024:      # v5e / v6e: plenty of VMEM
        target_bytes, row_cap = 48 * 1024 * 1024, 1024
    else:                                   # v7x: 64 MiB per TensorCore
        target_bytes, row_cap = 24 * 1024 * 1024, 512
    tn = row_cap
    while tn > 8 and 2 * tn * (h_pad + l_pad) * itemsize > target_bytes:
        tn //= 2
    # Leave work for a second TensorCore: at least 2 grid steps when possible.
    half = _round_up(max((n + 1) // 2, 1), 8)
    tn = min(tn, max(8, half))
    return max(8, min(tn, _round_up(max(n, 1), 8)))


def mrc_kernel(x_ref, w1_ref, ln_ref, w2_ref, b2_ref, lab_ref, out_ref, *, hidden):
    # x_ref:   [TN, H_pad]   masked hidden states (stream dtype, zero-padded)
    # w1_ref:  [H_pad, H_pad] pre-cast to mxu dtype (resident)
    # ln_ref:  [8, H_pad]    f32; rows 0/1/2 = b1 / gamma / beta (zero-padded)
    # w2_ref:  [H_pad, L_pad] pre-cast to mxu dtype (resident)
    # b2_ref:  [1, L_pad]    f32; padded lanes hold -1e30 (logit mask folded in)
    # lab_ref: [TN, L_pad]   soft region labels (zero in all padded positions)
    # out_ref: [8, L_pad]    lane-dense partial sums of -t*log_softmax(logits)
    f32 = jnp.float32
    h_pad = x_ref.shape[1]
    l_pad = lab_ref.shape[1]

    ln = ln_ref[...]
    b1 = ln[0:1, :]
    gamma = ln[1:2, :]
    beta = ln[2:3, :]

    # Linear(H, H) on the MXU. Operands were pre-cast in the wrapper; accumulate f32.
    h = jnp.dot(x_ref[...], w1_ref[...], preferred_element_type=f32) + b1

    # GELU (exact, erf-based -- matches torch.nn.GELU default). Padded lanes stay 0.
    h = 0.5 * h * (1.0 + lax.erf(h * f32(0.7071067811865476)))

    # LayerNorm over the first `hidden` lanes, biased variance, eps=1e-12.
    # h is exactly 0 in padded lanes, so the mean needs no mask; only the
    # variance does (d = -mu there).
    inv_h = f32(1.0 / hidden)
    mu = jnp.sum(h, axis=-1, keepdims=True) * inv_h
    feat_mask = (lax.broadcasted_iota(jnp.int32, (1, h_pad), 1) < hidden).astype(f32)
    d = (h - mu) * feat_mask
    var = jnp.sum(d * d, axis=-1, keepdims=True) * inv_h
    hn = d * lax.rsqrt(var + f32(LN_EPS)) * gamma + beta

    # Linear(H, label_dim). Only the per-tile activation needs a cast here;
    # padded logit lanes get -1e30 through b2, so no in-kernel lane mask.
    logits = jnp.dot(hn.astype(w2_ref.dtype), w2_ref[...],
                     preferred_element_type=f32) + b2_ref[...]

    # log_softmax over the last dim.
    m = jnp.max(logits, axis=-1, keepdims=True)
    z = logits - m
    lse = jnp.log(jnp.sum(jnp.exp(z), axis=-1, keepdims=True))
    logp = z - lse

    # Cross term of the KL divergence: -sum(t * logp). The data-only constant
    # sum(t * log t) is added once in the wrapper. Padded rows / lanes have
    # t == 0 and finite logp, so they contribute exactly 0 (no select needed).
    t = lab_ref[...].astype(f32)
    pointwise = t * (-logp)

    # Reduce this tile's rows in sublane groups -> lane-dense (8, L_pad) block.
    tn = pointwise.shape[0]
    out_ref[...] = jnp.sum(pointwise.reshape(tn // 8, 8, l_pad), axis=0)


def mrc_loss_pallas(masked_hidden, region_labels, params, n_valid, *,
                    tile_n=None, mxu_dtype=jnp.bfloat16):
    """KL-div 'batchmean' loss of the region classifier, fused in one Pallas call.

    mxu_dtype=bf16 (default) streams x / labels and holds w1 / w2 in bf16 with
    f32 accumulation -- intended training-loss precision (~1e-3 relative).
    Pass mxu_dtype=jnp.float32 for an exact f32 path."""
    w1, b1, gamma, beta, w2, b2 = params
    n, h = masked_hidden.shape
    l = region_labels.shape[1]
    h_pad = _round_up(h, 128)
    l_pad = _round_up(l, 128)

    f32 = jnp.float32
    stream_dtype = mxu_dtype          # streamed x / label tiles follow the MXU dtype
    s_item = jnp.dtype(stream_dtype).itemsize
    w_item = jnp.dtype(mxu_dtype).itemsize

    vmem_cap = _vmem_capacity_bytes()
    if tile_n is None:
        tile_n = _choose_tile_n(n, h_pad, l_pad, s_item, vmem_cap)
    tile_n = max(8, _round_up(min(tile_n, _round_up(max(n, 1), 8)), 8))
    n_pad = _round_up(max(n, 1), tile_n)
    num_tiles = n_pad // tile_n

    # Zero-pad to lane-dense shapes and pre-cast ONCE in the wrapper (the kernel
    # never re-casts the resident weights). Zero pads are exactly what the
    # in-kernel math assumes.
    x = jnp.pad(masked_hidden.astype(stream_dtype), ((0, n_pad - n), (0, h_pad - h)))
    lab = jnp.pad(region_labels.astype(stream_dtype), ((0, n_pad - n), (0, l_pad - l)))
    w1p = jnp.pad(w1.astype(mxu_dtype), ((0, h_pad - h), (0, h_pad - h)))
    w2p = jnp.pad(w2.astype(mxu_dtype), ((0, h_pad - h), (0, l_pad - l)))
    # b1 / gamma / beta packed into one lane-dense (8, H_pad) f32 operand.
    lnp = jnp.zeros((8, h_pad), f32)
    lnp = lnp.at[0, :h].set(b1.astype(f32))
    lnp = lnp.at[1, :h].set(gamma.astype(f32))
    lnp = lnp.at[2, :h].set(beta.astype(f32))
    # b2 carries the padded-lane logit mask, so the kernel drops the lane iota.
    b2p = jnp.full((1, l_pad), -1e30, f32).at[0, :l].set(b2.astype(f32))

    kernel = functools.partial(mrc_kernel, hidden=h)

    grid_spec = pltpu.PrefetchScalarGridSpec(
        num_scalar_prefetch=0,
        grid=(num_tiles,),
        in_specs=[
            pl.BlockSpec((tile_n, h_pad), lambda i: (i, 0)),   # x tile (streamed)
            pl.BlockSpec((h_pad, h_pad), lambda i: (0, 0)),    # w1 (resident)
            pl.BlockSpec((8, h_pad), lambda i: (0, 0)),        # b1/gamma/beta pack
            pl.BlockSpec((h_pad, l_pad), lambda i: (0, 0)),    # w2 (resident)
            pl.BlockSpec((1, l_pad), lambda i: (0, 0)),        # b2 (+ lane mask)
            pl.BlockSpec((tile_n, l_pad), lambda i: (i, 0)),   # labels tile
        ],
        out_specs=pl.BlockSpec((8, l_pad), lambda i: (i, 0)),  # lane-dense partials
    )

    # VMEM budget: double-buffered streamed tiles + (double-buffered) resident
    # weights + slack, never above physical VMEM minus headroom.
    tile_bytes = s_item * tile_n * (h_pad + l_pad)
    weight_bytes = w_item * h_pad * (h_pad + l_pad) + 4 * (8 * h_pad + l_pad)
    out_bytes = 4 * 8 * l_pad
    need = 2 * (tile_bytes + weight_bytes + out_bytes) + 4 * 1024 * 1024
    vmem_limit_bytes = int(min(vmem_cap - 4 * 1024 * 1024,
                               max(32 * 1024 * 1024, need)))

    # Advisory cost hint for XLA scheduling around the custom call.
    flops = int(2 * n_pad * h_pad * h_pad + 2 * n_pad * h_pad * l_pad
                + 10 * n_pad * (h_pad + l_pad))
    transcendentals = int(n_pad * (h_pad + l_pad + 2))
    bytes_accessed = int(s_item * n_pad * (h_pad + l_pad)
                         + w_item * h_pad * (h_pad + l_pad)
                         + 4 * (8 * h_pad + l_pad)
                         + 4 * num_tiles * 8 * l_pad)

    partials = pl.pallas_call(
        kernel,
        grid_spec=grid_spec,
        out_shape=jax.ShapeDtypeStruct((num_tiles * 8, l_pad), jnp.float32),
        compiler_params=pltpu.CompilerParams(
            dimension_semantics=("parallel",),
            vmem_limit_bytes=vmem_limit_bytes),
        cost_estimate=pl.CostEstimate(flops=flops,
                                      transcendentals=transcendentals,
                                      bytes_accessed=bytes_accessed),
    )(x, w1p, lnp, w2p, b2p, lab)

    # KL pointwise = t*(log t - logp) for t > 0. Kernel returned -t*logp; add the
    # data-only entropy constant here (computed from the exact f32 labels).
    t32 = region_labels.astype(f32)
    ent = jnp.sum(jnp.where(t32 > 0, t32 * jnp.log(jnp.where(t32 > 0, t32, 1.0)), 0.0))
    cross = jnp.sum(partials)
    # 'batchmean': divide by the number of masked rows.
    return (ent + cross) / n_valid.astype(f32)


def compute_masked_hidden(hidden, mask, n_rows):
    """jit-friendly equivalent of hidden[mask].view(-1, H): a static-size index
    gather. Assumes (like the PyTorch module) that n_rows == sum(mask); padded
    slots point at row 0 and are neutralized by their all-zero labels."""
    b, s, h = hidden.shape
    flat = hidden.reshape(b * s, h)
    idx = jnp.nonzero(mask.reshape(-1), size=n_rows, fill_value=0)[0]
    return jnp.take(flat, idx, axis=0)


def mrc_forward(sequence_output, processed_sample_list, params, *,
                mxu_dtype=jnp.bfloat16):
    region_labels = processed_sample_list["region_class"]
    image_region_masks = processed_sample_list["image_region_mask"]
    n = region_labels.shape[0]
    masked_output = compute_masked_hidden(sequence_output, image_region_masks, n)
    n_valid = jnp.sum(image_region_masks).astype(jnp.float32)
    loss = mrc_loss_pallas(masked_output, region_labels, params, n_valid,
                           mxu_dtype=mxu_dtype)
    return {"losses": {"mrc_loss": loss}}


def _reference(masked_hidden, params, region_labels):
    # Pure-JAX reference (unpadded) for a sanity check.
    w1, b1, gamma, beta, w2, b2 = params
    h = masked_hidden @ w1 + b1
    h = 0.5 * h * (1.0 + lax.erf(h / jnp.sqrt(2.0)))
    mu = jnp.mean(h, -1, keepdims=True)
    var = jnp.mean((h - mu) ** 2, -1, keepdims=True)
    h = (h - mu) / jnp.sqrt(var + LN_EPS) * gamma + beta
    logits = h @ w2 + b2
    logp = jax.nn.log_softmax(logits, axis=-1)
    t = region_labels
    pw = jnp.where(t > 0, t * (jnp.log(jnp.where(t > 0, t, 1.0)) - logp), 0.0)
    return jnp.sum(pw) / masked_hidden.shape[0]


if __name__ == "__main__":
    key = jax.random.PRNGKey(0)
    (k_seq, k_w1, k_b1, k_w2, k_b2, k_lab,
     k_seq2, k_lab2) = jax.random.split(key, 8)

    H, L = HIDDEN, LABEL_DIM

    # Deterministic parameter init (weights stored as [in, out]).
    w1 = jax.random.normal(k_w1, (H, H), jnp.float32) * 0.02
    b1 = jax.random.normal(k_b1, (H,), jnp.float32) * 0.02
    gamma = jnp.ones((H,), jnp.float32)
    beta = jnp.zeros((H,), jnp.float32)
    w2 = jax.random.normal(k_w2, (H, L), jnp.float32) * 0.02
    b2 = jax.random.normal(k_b2, (L,), jnp.float32) * 0.02
    params = (w1, b1, gamma, beta, w2, b2)

    # --- Case 1: module-style forward at the small synthetic size (N = 8),
    #             exact f32 path for a tight correctness check ---
    B, S = 2, 8
    sequence_output = jax.random.normal(k_seq, (B, S, H), jnp.float32)
    image_region_mask = jnp.zeros((B, S), dtype=bool).at[:, 2:6].set(True)
    n_masked = 8
    region_class = jax.nn.softmax(
        jax.random.normal(k_lab, (n_masked, L), jnp.float32), axis=-1)
    sample_list = {"region_class": region_class,
                   "image_region_mask": image_region_mask}

    fwd_f32 = jax.jit(lambda so, sl: mrc_forward(so, sl, params,
                                                 mxu_dtype=jnp.float32))
    loss = jax.block_until_ready(
        fwd_f32(sequence_output, sample_list)["losses"]["mrc_loss"])
    ref = _reference(sequence_output[image_region_mask], params, region_class)
    assert jnp.allclose(loss, ref, rtol=1e-4, atol=1e-4), (loss, ref)

    # --- Case 2: larger N with a small explicit tile to exercise the grid and
    #             the padded-row path (N = 80, tile_n = 32 -> 3 parallel tiles) ---
    B2, S2 = 2, 64
    seq2 = jax.random.normal(k_seq2, (B2, S2, H), jnp.float32)
    mask2 = jnp.zeros((B2, S2), dtype=bool).at[:, :40].set(True)
    n2 = 80
    labels2 = jax.nn.softmax(
        jax.random.normal(k_lab2, (n2, L), jnp.float32), axis=-1)

    def loss_fn2(so, lab, msk):
        x = compute_masked_hidden(so, msk, n2)
        nv = jnp.sum(msk).astype(jnp.float32)
        return mrc_loss_pallas(x, lab, params, nv, tile_n=32,
                               mxu_dtype=jnp.float32)

    loss2 = jax.block_until_ready(jax.jit(loss_fn2)(seq2, labels2, mask2))
    ref2 = _reference(seq2[mask2], params, labels2)
    assert jnp.allclose(loss2, ref2, rtol=1e-4, atol=1e-4), (loss2, ref2)

    # --- Case 3: default bf16 MXU / streaming path (v5e/v6e/v7x fast path);
    #             f32 accumulation keeps the loss within training tolerance ---
    fwd_bf16 = jax.jit(lambda so, sl: mrc_forward(so, sl, params))
    loss_bf16 = jax.block_until_ready(
        fwd_bf16(sequence_output, sample_list)["losses"]["mrc_loss"])
    assert jnp.allclose(loss_bf16, ref, rtol=5e-2, atol=1e-2), (loss_bf16, ref)

    print("KERNEL_OK")
</pallas_src>

<mosaic_0001>
module attributes {stable_mosaic.version = 11 : i64} {
  func.func private @main(%arg0: i32) attributes {dimension_semantics = [#tpu.dimension_semantics<core_parallel>], iteration_bounds = array<i64: 2>, tpu.core_type = #tpu.core_type<sc_scalar_subcore>, window_params = []} {
    return
  }
}

module attributes {stable_mosaic.version = 11 : i64} {
  func.func private @main(%arg0: i32) attributes {dimension_semantics = [#tpu.dimension_semantics<core_parallel>], iteration_bounds = array<i64: 2>, tpu.core_type = #tpu.core_type<sc_scalar_subcore>, window_params = []} {
    return
  }
}

module attributes {stable_mosaic.version = 11 : i64} {
  func.func @mrc_kernel(%arg0: i32, %arg1: memref<8x128xf32, #tpu.memory_space<vmem>>, %arg2: memref<128x128xf32, #tpu.memory_space<vmem>>, %arg3: memref<8x128xf32, #tpu.memory_space<vmem>>, %arg4: memref<128x128xf32, #tpu.memory_space<vmem>>, %arg5: memref<1x128xf32, #tpu.memory_space<vmem>>, %arg6: memref<8x128xf32, #tpu.memory_space<vmem>>, %arg7: memref<8x128xf32, #tpu.memory_space<vmem>>) attributes {dimension_semantics = [#tpu.dimension_semantics<parallel>], iteration_bounds = array<i64: 1>, scalar_prefetch = 0 : i64, scratch_operands = 0 : i64, tpu.core_type = #tpu.core_type<tc>, window_params = [{transform_indices = @transform_0, window_bounds = array<i64: 8, 128>}, {pipeline_mode = #tpu.pipeline_mode<synchronous>, transform_indices = @transform_1, window_bounds = array<i64: 128, 128>}, {pipeline_mode = #tpu.pipeline_mode<synchronous>, transform_indices = @transform_2, window_bounds = array<i64: 8, 128>}, {pipeline_mode = #tpu.pipeline_mode<synchronous>, transform_indices = @transform_3, window_bounds = array<i64: 128, 128>}, {pipeline_mode = #tpu.pipeline_mode<synchronous>, transform_indices = @transform_4, window_bounds = array<i64: 1, 128>}, {transform_indices = @transform_5, window_bounds = array<i64: 8, 128>}, {transform_indices = @transform_6, window_bounds = array<i64: 8, 128>}]} {
    %c0 = arith.constant 0 : index
    %c0_0 = arith.constant 0 : index
    %0 = vector.load %arg3[%c0, %c0_0] : memref<8x128xf32, #tpu.memory_space<vmem>>, vector<8x128xf32>
    %1 = vector.extract_strided_slice %0 {offsets = [0, 0], sizes = [1, 128], strides = [1, 1]} : vector<8x128xf32> to vector<1x128xf32>
    %2 = vector.extract_strided_slice %0 {offsets = [1, 0], sizes = [1, 128], strides = [1, 1]} : vector<8x128xf32> to vector<1x128xf32>
    %3 = vector.extract_strided_slice %0 {offsets = [2, 0], sizes = [1, 128], strides = [1, 1]} : vector<8x128xf32> to vector<1x128xf32>
    %c0_1 = arith.constant 0 : index
    %c0_2 = arith.constant 0 : index
    %4 = vector.load %arg1[%c0_1, %c0_2] : memref<8x128xf32, #tpu.memory_space<vmem>>, vector<8x128xf32>
    %c0_3 = arith.constant 0 : index
    %c0_4 = arith.constant 0 : index
    %5 = vector.load %arg2[%c0_3, %c0_4] : memref<128x128xf32, #tpu.memory_space<vmem>>, vector<128x128xf32>
    %cst = arith.constant dense<0.000000e+00> : vector<8x128xf32>
    %6 = tpu.matmul %4, %5, %cst {dimension_numbers = #tpu.dot_dimension_numbers<[1], [0], [0], [1], [0, 0, 1, 1], [], []>} : vector<8x128xf32>, vector<128x128xf32>, vector<8x128xf32> -> vector<8x128xf32>
    %7 = vector.broadcast %1 : vector<1x128xf32> to vector<8x128xf32>
    %8 = arith.addf %6, %7 : vector<8x128xf32>
    %cst_5 = arith.constant 5.000000e-01 : f32
    %9 = vector.broadcast %cst_5 : f32 to vector<8x128xf32>
    %10 = arith.mulf %9, %8 : vector<8x128xf32>
    %cst_6 = arith.constant 0.707106769 : f32
    %11 = vector.broadcast %cst_6 : f32 to vector<8x128xf32>
    %12 = arith.mulf %8, %11 : vector<8x128xf32>
    %13 = math.erf %12 : vector<8x128xf32>
    %cst_7 = arith.constant 1.000000e+00 : f32
    %14 = vector.broadcast %cst_7 : f32 to vector<8x128xf32>
    %15 = arith.addf %14, %13 : vector<8x128xf32>
    %16 = arith.mulf %10, %15 : vector<8x128xf32>
    %cst_8 = arith.constant dense<0.000000e+00> : vector<8xf32>
    %17 = vector.multi_reduction <add>, %16, %cst_8 [1] : vector<8x128xf32> to vector<8xf32>
    %18 = vector.shape_cast %17 : vector<8xf32> to vector<8x1xf32>
    %cst_9 = arith.constant 3.125000e-02 : f32
    %19 = vector.broadcast %cst_9 : f32 to vector<8x1xf32>
    %20 = arith.mulf %18, %19 : vector<8x1xf32>
    %21 = tpu.iota {dimensions = array<i32: 1>} : vector<1x128xi32>
    %c32_i32 = arith.constant 32 : i32
    %22 = vector.broadcast %c32_i32 : i32 to vector<1x128xi32>
    %23 = arith.cmpi slt, %21, %22 : vector<1x128xi32>
    %24 = arith.extui %23 : vector<1x128xi1> to vector<1x128xi32>
    %25 = arith.sitofp %24 : vector<1x128xi32> to vector<1x128xf32>
    %26 = vector.broadcast %20 : vector<8x1xf32> to vector<8x128xf32>
    %27 = arith.subf %16, %26 : vector<8x128xf32>
    %28 = vector.broadcast %25 : vector<1x128xf32> to vector<8x128xf32>
    %29 = arith.mulf %27, %28 : vector<8x128xf32>
    %30 = arith.mulf %29, %29 : vector<8x128xf32>
    %cst_10 = arith.constant dense<0.000000e+00> : vector<8xf32>
    %31 = vector.multi_reduction <add>, %30, %cst_10 [1] : vector<8x128xf32> to vector<8xf32>
    %32 = vector.shape_cast %31 : vector<8xf32> to vector<8x1xf32>
    %cst_11 = arith.constant 3.125000e-02 : f32
    %33 = vector.broadcast %cst_11 : f32 to vector<8x1xf32>
    %34 = arith.mulf %32, %33 : vector<8x1xf32>
    %cst_12 = arith.constant 9.99999996E-13 : f32
    %35 = vector.broadcast %cst_12 : f32 to vector<8x1xf32>
    %36 = arith.addf %34, %35 : vector<8x1xf32>
    %37 = math.rsqrt %36 : vector<8x1xf32>
    %38 = vector.broadcast %37 : vector<8x1xf32> to vector<8x128xf32>
    %39 = arith.mulf %29, %38 : vector<8x128xf32>
    %40 = vector.broadcast %2 : vector<1x128xf32> to vector<8x128xf32>
    %41 = arith.mulf %39, %40 : vector<8x128xf32>
    %42 = vector.broadcast %3 : vector<1x128xf32> to vector<8x128xf32>
    %43 = arith.addf %41, %42 : vector<8x128xf32>
    %c0_13 = arith.constant 0 : index
    %c0_14 = arith.constant 0 : index
    %44 = vector.load %arg4[%c0_13, %c0_14] : memref<128x128xf32, #tpu.memory_space<vmem>>, vector<128x128xf32>
    %cst_15 = arith.constant dense<0.000000e+00> : vector<8x128xf32>
    %45 = tpu.matmul %43, %44, %cst_15 {dimension_numbers = #tpu.dot_dimension_numbers<[1], [0], [0], [1], [0, 0, 1, 1], [], []>} : vector<8x128xf32>, vector<128x128xf32>, vector<8x128xf32> -> vector<8x128xf32>
    %c0_16 = arith.constant 0 : index
    %c0_17 = arith.constant 0 : index
    %46 = vector.load %arg5[%c0_16, %c0_17] : memref<1x128xf32, #tpu.memory_space<vmem>>, vector<1x128xf32>
    %47 = vector.broadcast %46 : vector<1x128xf32> to vector<8x128xf32>
    %48 = arith.addf %45, %47 : vector<8x128xf32>
    %cst_18 = arith.constant dense<0xFF800000> : vector<8xf32>
    %49 = vector.multi_reduction <maximumf>, %48, %cst_18 [1] : vector<8x128xf32> to vector<8xf32>
    %50 = vector.shape_cast %49 : vector<8xf32> to vector<8x1xf32>
    %51 = vector.broadcast %50 : vector<8x1xf32> to vector<8x128xf32>
    %52 = arith.subf %48, %51 : vector<8x128xf32>
    %53 = math.exp %52 : vector<8x128xf32>
    %cst_19 = arith.constant dense<0.000000e+00> : vector<8xf32>
    %54 = vector.multi_reduction <add>, %53, %cst_19 [1] : vector<8x128xf32> to vector<8xf32>
    %55 = vector.shape_cast %54 : vector<8xf32> to vector<8x1xf32>
    %56 = math.log %55 : vector<8x1xf32>
    %57 = vector.broadcast %56 : vector<8x1xf32> to vector<8x128xf32>
    %58 = arith.subf %52, %57 : vector<8x128xf32>
    %c0_20 = arith.constant 0 : index
    %c0_21 = arith.constant 0 : index
    %59 = vector.load %arg6[%c0_20, %c0_21] : memref<8x128xf32, #tpu.memory_space<vmem>>, vector<8x128xf32>
    %cst_22 = arith.constant 0.000000e+00 : f32
    %60 = vector.broadcast %cst_22 : f32 to vector<8x128xf32>
    %61 = arith.subf %60, %58 : vector<8x128xf32>
    %62 = arith.mulf %59, %61 : vector<8x128xf32>
    %63 = vector.shape_cast %62 : vector<8x128xf32> to vector<1x8x128xf32>
    %cst_23 = arith.constant dense<0.000000e+00> : vector<8x128xf32>
    %64 = vector.multi_reduction <add>, %63, %cst_23 [0] : vector<1x8x128xf32> to vector<8x128xf32>
    %c0_24 = arith.constant 0 : index
    %c0_25 = arith.constant 0 : index
    %65 = vector.load %arg7[%c0_24, %c0_25] : memref<8x128xf32, #tpu.memory_space<vmem>>, vector<8x128xf32>
    tpu.vector_store %arg7[%c0_24, %c0_25], %64 {strides = array<i32>} : memref<8x128xf32, #tpu.memory_space<vmem>>, vector<8x128xf32>,
    return
  }
  func.func @transform_0(%arg0: i32) -> (i32, i32) {
    %c0_i32 = arith.constant 0 : i32
    %c0_i32_0 = arith.constant 0 : i32
    return %arg0, %c0_i32 : i32, i32
  }
  func.func @transform_1(%arg0: i32) -> (i32, i32) {
    %c0_i32 = arith.constant 0 : i32
    %c0_i32_0 = arith.constant 0 : i32
    %c0_i32_1 = arith.constant 0 : i32
    return %c0_i32, %c0_i32_0 : i32, i32
  }
  func.func @transform_2(%arg0: i32) -> (i32, i32) {
    %c0_i32 = arith.constant 0 : i32
    %c0_i32_0 = arith.constant 0 : i32
    %c0_i32_1 = arith.constant 0 : i32
    return %c0_i32, %c0_i32_0 : i32, i32
  }
  func.func @transform_3(%arg0: i32) -> (i32, i32) {
    %c0_i32 = arith.constant 0 : i32
    %c0_i32_0 = arith.constant 0 : i32
    %c0_i32_1 = arith.constant 0 : i32
    return %c0_i32, %c0_i32_0 : i32, i32
  }
  func.func @transform_4(%arg0: i32) -> (i32, i32) {
    %c0_i32 = arith.constant 0 : i32
    %c0_i32_0 = arith.constant 0 : i32
    %c0_i32_1 = arith.constant 0 : i32
    return %c0_i32, %c0_i32_0 : i32, i32
  }
  func.func @transform_5(%arg0: i32) -> (i32, i32) {
    %c0_i32 = arith.constant 0 : i32
    %c0_i32_0 = arith.constant 0 : i32
    return %arg0, %c0_i32 : i32, i32
  }
  func.func @transform_6(%arg0: i32) -> (i32, i32) {
    %c0_i32 = arith.constant 0 : i32
    %c0_i32_0 = arith.constant 0 : i32
    return %arg0, %c0_i32 : i32, i32
  }
}

</mosaic_0001>

<bundles_post_ra>
// kernel: _lambda_.1
= control target key start
LH: loop header
LB: loop body
LE: loop exit
PB: predicated region body
PF: predicated region fallthrough
CT: control target
= control target key end

     0   :  { %v375_v0 = vmov 0.0   ;;  %vm376_vm0 = vmmov 0   ;;  %v41_v18 = vlaneseq  ;;  %s568_s1 = inlined_call_operand.vmem [shape: f32[128,128], index: 1, kind: input, shape index: {}]   ;;  %s569_s0 = inlined_call_operand.vmem [shape: f32[8,128], index: 0, kind: input, shape index: {}]   ;;  %s570_s2 = inlined_call_operand.vmem [shape: f32[8,128], index: 2, kind: input, shape index: {}]   ;;  %s571_s3 = inlined_call_operand.vmem [shape: f32[128,128], index: 3, kind: input, shape index: {}]   ;;  %s572_s4 = inlined_call_operand.vmem [shape: f32[1,128], index: 4, kind: input, shape index: {}]   ;;  %s573_s5 = inlined_call_operand.vmem [shape: f32[8,128], index: 5, kind: input, shape index: {}]   ;;  %s574_s6 = inlined_call_operand.vmem [shape: f32[8,128], index: 6, kind: output, shape index: {}]  }
   0x1   :  { %295 = vmatprep.subr.mxu0 %v375_v0  ;;  %v40_v1 = vld [vmem:[%s568_s1 + $0x78] sm:$0xff]  ;;  %v39_v2 = vld [vmem:[%s568_s1 + $0x70] sm:$0xff]  ;;  %327 = vmatprep.mubr.msk.f32.mxu0 %vm376_vm0, %v375_v0  ;;  %v38_v3 = vld [vmem:[%s568_s1 + $0x68] sm:$0xff] }
   0x2   :  { %296 = vmatpush3.msra.mxu0 %v40_v1  ;;  %330 = vmatprep.subr.mxu1 %v375_v0  ;;  %v37_v4 = vld [vmem:[%s568_s1 + $0x60] sm:$0xff]  ;;  %v36_v5 = vld [vmem:[%s568_s1 + $0x58] sm:$0xff]  ;;  %v35_v6 = vld [vmem:[%s568_s1 + $0x50] sm:$0xff]  ;;  %v482_v19 = vshrl.u32 %v41_v18, 7  ;;  %v124_v35 = vand.u32 127, %v41_v18 }
   0x3   :  { %297 = vmatprep.subr.mxu0 %v375_v0  ;;  %362 = vmatprep.mubr.msk.f32.mxu1 %vm376_vm0, %v375_v0  ;;  %v34_v7 = vld [vmem:[%s568_s1 + $0x48] sm:$0xff]  ;;  %v33_v8 = vld [vmem:[%s568_s1 + $0x40] sm:$0xff]  ;;  %v32_v9 = vld [vmem:[%s568_s1 + $0x38] sm:$0xff] }
   0x4   :  { %298 = vmatpush3.msra.mxu0 %v39_v2  ;;  %v31_v10 = vld [vmem:[%s568_s1 + $0x30] sm:$0xff]  ;;  %v30_v11 = vld [vmem:[%s568_s1 + $0x28] sm:$0xff]  ;;  %v29_v12 = vld [vmem:[%s568_s1 + $0x20] sm:$0xff]  ;;  %v43_v20 = vsub.s32 0, %v482_v19  ;;  %vm125_vm1 = vcmp.lt.s32.totalorder %v124_v35, 32  ;;  %v139_v57 = vsub.s32 1, %v482_v19 }
   0x5   :  { %299 = vmatprep.subr.mxu0 %v375_v0  ;;  %v28_v13 = vld [vmem:[%s568_s1 + $0x18] sm:$0xff]  ;;  %v27_v14 = vld [vmem:[%s568_s1 + $0x10] sm:$0xff]  ;;  %v26_v15 = vld [vmem:[%s568_s1 + $0x8] sm:$0xff]  ;;  %v259_v38 = vsel %vm125_vm1, 1.0, %v375_v0  ;;  %v144_v58 = vsub.s32 2, %v482_v19 }
   0x6   :  { %300 = vmatpush3.msra.mxu0 %v38_v3  ;;  %v25_v16 = vld [vmem:[%s568_s1] sm:$0xff]  ;;  %v162_v31 = vld [vmem:[%s571_s3 + $0x78] sm:$0xff]  ;;  %v161_v32 = vld [vmem:[%s571_s3 + $0x70] sm:$0xff] }
   0x7   :  { %301 = vmatprep.subr.mxu0 %v375_v0  ;;  %v24_v17 = vld [vmem:[%s569_s0] sm:$0xff]  ;;  %331 = vmatpush3.msra.mxu1 %v162_v31  ;;  %v160_v33 = vld [vmem:[%s571_s3 + $0x68] sm:$0xff]  ;;  %v158_v42 = vld [vmem:[%s571_s3 + $0x58] sm:$0xff] }
   0x8   :  { %302 = vmatpush3.msra.mxu0 %v37_v4  ;;  %v488_v21 = vld [vmem:[%s570_s2] sm:$0xff]  ;;  %332 = vmatprep.subr.mxu1 %v375_v0  ;;  %v157_v43 = vld [vmem:[%s571_s3 + $0x50] sm:$0xff]  ;;  %v156_v44 = vld [vmem:[%s571_s3 + $0x48] sm:$0xff] }
   0x9   :  { %303 = vmatprep.subr.mxu0 %v375_v0  ;;  %v44_v22 = vrot.slane %v488_v21, %v43_v20  ;;  %333 = vmatpush3.msra.mxu1 %v161_v32  ;;  %v159_v34 = vld [vmem:[%s571_s3 + $0x60] sm:$0xff]  ;;  %v154_v46 = vld [vmem:[%s571_s3 + $0x38] sm:$0xff]  ;;  %v153_v47 = vld [vmem:[%s571_s3 + $0x30] sm:$0xff]  ;;  %v140_v59 = vrot.slane %v488_v21, %v139_v57  ;;  %v145_v62 = vrot.slane %v488_v21, %v144_v58 }
   0xa   :  { %304 = vmatpush3.msra.mxu0 %v36_v5  ;;  %334 = vmatprep.subr.mxu1 %v375_v0  ;;  %v155_v45 = vld [vmem:[%s571_s3 + $0x40] sm:$0xff]  ;;  %v152_v48 = vld [vmem:[%s571_s3 + $0x28] sm:$0xff]  ;;  %v150_v50 = vld [vmem:[%s571_s3 + $0x18] sm:$0xff] }
   0xb   :  { %305 = vmatprep.subr.mxu0 %v375_v0  ;;  %335 = vmatpush3.msra.mxu1 %v160_v33  ;;  %v151_v49 = vld [vmem:[%s571_s3 + $0x20] sm:$0xff]  ;;  %v149_v51 = vld [vmem:[%s571_s3 + $0x10] sm:$0xff]  ;;  %v148_v52 = vld [vmem:[%s571_s3 + $0x8] sm:$0xff] }
   0xc   :  { %306 = vmatpush3.msra.mxu0 %v35_v6  ;;  %336 = vmatprep.subr.mxu1 %v375_v0  ;;  %v147_v53 = vld [vmem:[%s571_s3] sm:$0xff] }
   0xd   :  { %307 = vmatprep.subr.mxu0 %v375_v0  ;;  %337 = vmatpush3.msra.mxu1 %v159_v34 }
   0xe   :  { %308 = vmatpush3.msra.mxu0 %v34_v7  ;;  %338 = vmatprep.subr.mxu1 %v375_v0 }
   0xf   :  { %309 = vmatprep.subr.mxu0 %v375_v0  ;;  %339 = vmatpush3.msra.mxu1 %v158_v42 }
  0x10   :  { %310 = vmatpush3.msra.mxu0 %v33_v8  ;;  %340 = vmatprep.subr.mxu1 %v375_v0 }
  0x11   :  { %311 = vmatprep.subr.mxu0 %v375_v0  ;;  %341 = vmatpush3.msra.mxu1 %v157_v43 }
  0x12   :  { %312 = vmatpush3.msra.mxu0 %v32_v9  ;;  %342 = vmatprep.subr.mxu1 %v375_v0 }
  0x13   :  { %313 = vmatprep.subr.mxu0 %v375_v0  ;;  %343 = vmatpush3.msra.mxu1 %v156_v44 }
  0x14   :  { %314 = vmatpush3.msra.mxu0 %v31_v10  ;;  %344 = vmatprep.subr.mxu1 %v375_v0 }
  0x15   :  { %315 = vmatprep.subr.mxu0 %v375_v0  ;;  %345 = vmatpush3.msra.mxu1 %v155_v45 }
  0x16   :  { %316 = vmatpush3.msra.mxu0 %v30_v11  ;;  %346 = vmatprep.subr.mxu1 %v375_v0 }
  0x17   :  { %317 = vmatprep.subr.mxu0 %v375_v0  ;;  %347 = vmatpush3.msra.mxu1 %v154_v46 }
  0x18   :  { %318 = vmatpush3.msra.mxu0 %v29_v12  ;;  %348 = vmatprep.subr.mxu1 %v375_v0 }
  0x19   :  { %319 = vmatprep.subr.mxu0 %v375_v0  ;;  %349 = vmatpush3.msra.mxu1 %v153_v47 }
  0x1a   :  { %320 = vmatpush3.msra.mxu0 %v28_v13  ;;  %350 = vmatprep.subr.mxu1 %v375_v0  ;;  %v250_v13 = vld [vmem:[%s573_s5] sm:$0xff] }
  0x1b   :  { %321 = vmatprep.subr.mxu0 %v375_v0  ;;  %351 = vmatpush3.msra.mxu1 %v152_v48 }
  0x1c   :  { %322 = vmatpush3.msra.mxu0 %v27_v14  ;;  %352 = vmatprep.subr.mxu1 %v375_v0 }
  0x1d   :  { %323 = vmatprep.subr.mxu0 %v375_v0  ;;  %353 = vmatpush3.msra.mxu1 %v151_v49 }
  0x1e   :  { %324 = vmatpush3.msra.mxu0 %v26_v15  ;;  %354 = vmatprep.subr.mxu1 %v375_v0 }
  0x1f   :  { %325 = vmatprep.subr.mxu0 %v375_v0  ;;  %355 = vmatpush3.msra.mxu1 %v150_v50 }
  0x20   :  { %326 = vmatpush3.msra.mxu0 %v25_v16  ;;  %356 = vmatprep.subr.mxu1 %v375_v0 }
  0x21   :  { %328 = vmatmul.mubr.f32.vlgmr.msra.gmra.mxu0 %v24_v17  ;;  %357 = vmatpush3.msra.mxu1 %v149_v51 }
  0x22   :  { %358 = vmatprep.subr.mxu1 %v375_v0 }
  0x23   :  { %359 = vmatpush3.msra.mxu1 %v148_v52 }
  0x24   :  { %360 = vmatprep.subr.mxu1 %v375_v0  ;;  %v260_v0 = vld [vmem:[%s572_s4] ss:$0 sm:$0xff] }
  0x25   :  { %361 = vmatpush3.msra.mxu1 %v147_v53 }
  0xe1   :  { %v111_v23 = vpop.f32.mrf.mxu0 }
  0xe2   :  { %v112_v24 = vadd.f32 %v111_v23, %v44_v22 }
  0xe3   :  { %v329_v25 = vpop.f32.mrf.mxu0 }
  0xe4   :  { %v116_v26 = vmul.f32 0.70710677, %v112_v24  ;;  %v115_v28 = vmul.f32 0.5, %v112_v24 }
  0xe6   :  { %367 = verf.f32 %v116_v26 }
  0xf3   :  { %v368_v27 = vpop.eup %367 }
  0xf4   :  { %v118_v29 = vadd.f32 1.0, %v368_v27 }
  0xf6   :  { %v119_v30 = vmul.f32 %v118_v29, %v115_v28 }
  0xf8   :  { %120 = vadd.xlane.f32.xlu0 %v119_v30 }
 0x181   :  { %v121_v36 = vpop.xlane.xlu0 %120 }
 0x182   :  { %v122_v37 = vmul.f32 0.03125, %v121_v36 }
 0x184   :  { %v128_v39 = vsub.f32 %v119_v30, %v122_v37 }
 0x186   :  { %v129_v40 = vmul.f32 %v259_v38, %v128_v39 }
 0x188   :  { %v130_v41 = vmul.f32 %v129_v40, %v129_v40 }
 0x18a   :  { %131 = vadd.xlane.f32.xlu0 %v130_v41 }
 0x213   :  { %v132_v54 = vpop.xlane.xlu0 %131 }
 0x214   :  { %v133_v55 = vmul.f32 0.03125, %v132_v54 }
 0x216   :  { %v134_v56 = vadd.f32 1e-12, %v133_v55 }
 0x218   :  { %369 = vrsqrt.f32 %v134_v56 }
 0x225   :  { %v370_v60 = vpop.eup %369 }
 0x226   :  { %v136_v61 = vmul.f32 %v370_v60, %v129_v40 }
 0x228   :  { %v141_v63 = vmul.f32 %v140_v59, %v136_v61 }
 0x22a   :  { %v146_v1 = vadd.f32 %v145_v62, %v141_v63 }
 0x22c   :  { %363 = vmatmul.mubr.f32.vlgmr.msra.gmra.mxu1 %v146_v1 }
 0x2ec   :  { %v236_v2 = vpop.f32.mrf.mxu1 }
 0x2ed   :  { %v237_v3 = vadd.f32 %v260_v0, %v236_v2 }
 0x2ee   :  { %v364_v4 = vpop.f32.mrf.mxu1 }
 0x2ef   :  { %240 = vmax.xlane.f32.xlu1 %v237_v3 }
 0x378   :  { %v241_v5 = vpop.xlane.xlu1 %240 }
 0x379   :  { %v242_v6 = vsub.f32 %v237_v3, %v241_v5 }
 0x37b   :  { %v243_v7 = vmul.f32 1.442695, %v242_v6 }
 0x37d   :  { %371 = vpow2.f32 %v243_v7 }
 0x38a   :  { %v372_v8 = vpop.eup %371 }
 0x38b   :  { %245 = vadd.xlane.f32.xlu1 %v372_v8 }
 0x414   :  { %v246_v9 = vpop.xlane.xlu1 %245 }
 0x415   :  { %373 = vlog2.f32 %v246_v9 }
 0x422   :  { %v374_v10 = vpop.eup %373 }
 0x423   :  { %v248_v11 = vmul.f32 0.6931472, %v374_v10 }
 0x425   :  { %v249_v12 = vsub.f32 %v242_v6, %v248_v11 }
 0x427   :  { %v251_v14 = vsub.f32 0.0, %v249_v12 }
 0x429   :  { %v252_v15 = vmul.f32 %v251_v14, %v250_v13 }
 0x42b   :  { %254 = vst [vmem:[%s574_s6] sm:$0xff] %v252_v15 }

</bundles_post_ra>
